<compile_context>
chip_gen: v7x
topology: tpu7x:2x2x1
jax: 0.10.0
libtpu: 0.0.40
codegen_flags: <defaults>
</compile_context>

<pallas_src>
import functools

import jax
import jax.numpy as jnp
from jax.experimental import pallas as pl
from jax.experimental.pallas import tpu as pltpu


def _round_up(x, m):
    return ((x + m - 1) // m) * m


def _tpu_vmem_and_cores():
    """Best-effort query: (physical VMEM bytes, has multiple TensorCores per device)."""
    vmem_bytes = 64 << 20  # conservative default = v7x per-TC capacity
    try:
        vmem_bytes = int(pltpu.get_tpu_info().vmem_capacity_bytes)
    except Exception:
        pass
    multi_core = False
    try:
        kind = jax.devices()[0].device_kind.lower()
        # v7x exposes 2 TensorCores per chip; older single-TC chips keep "parallel".
        multi_core = ("7x" in kind) or ("v7" in kind)
    except Exception:
        pass
    return vmem_bytes, multi_core


def _layernorm_kernel(x_ref, w_ref, b_ref, o_ref, *, eps, inv_d):
    # x_ref: (tile_rows, D) block; w_ref/b_ref: (1, D) f32 params (VMEM-resident).
    x = x_ref[...].astype(jnp.float32)
    # Single pass over the tile: both reductions issue on the XLU directly from x.
    s = jnp.sum(x, axis=-1, keepdims=True)
    ss = jnp.sum(x * x, axis=-1, keepdims=True)
    mean = s * inv_d
    var = jnp.maximum(ss * inv_d - mean * mean, 0.0)  # biased var, clamped >= 0
    inv = jax.lax.rsqrt(var + eps)                    # EUP rsqrt
    scale = inv * w_ref[...]                          # (rows, D)
    shift = b_ref[...] - mean * scale                 # (rows, D)
    o_ref[...] = (x * scale + shift).astype(o_ref.dtype)


def _pick_tile_rows(rows, D, itemsize, vmem_bytes, multi_core):
    # Per-row working set: double-buffered input + output blocks (native dtype)
    # plus ~3 f32 temporaries live in the body (x_f32, scale, shift).
    per_row_bytes = D * (4 * itemsize + 12)
    tile_budget = (vmem_bytes * 3) // 8  # 24 MiB on v7x (64 MiB), 48 MiB on v5e/v6e (128 MiB)
    t = tile_budget // max(per_row_bytes, 1)
    t = max(8, min(1024, (t // 8) * 8))          # sublane multiple of 8, diminishing returns >1024
    t = min(t, max(8, _round_up(rows, 8)))       # never bigger than the (rounded-up) input
    # Prefer >=2 grid steps per TensorCore for pipelining / core-parallel split,
    # but never shrink the input block below a ~2 MiB DMA floor: block size is
    # the dominant lever for this memory-bound kernel.
    min_steps = 4 if multi_core else 2
    steps_cap = max(8, _round_up(pl.cdiv(rows, min_steps), 8))
    min_block_bytes = 2 << 20
    if steps_cap * D * itemsize >= min_block_bytes:
        t = min(t, steps_cap)
    return t, per_row_bytes


def _make_x_spec(tile_rows, D, buffered3):
    idx = lambda i: (i, 0)
    if buffered3:
        try:
            return pl.BlockSpec((tile_rows, D), idx, pipeline_mode=pl.Buffered(3))
        except Exception:
            pass
    return pl.BlockSpec((tile_rows, D), idx)


def layer_norm(x, weight=None, bias=None, *, eps=1e-5, tile_rows=None):
    """LayerNorm over the last dim of x. x: (..., D). weight/bias: (D,) or None."""
    orig_shape = x.shape
    D = int(orig_shape[-1])
    rows = 1
    for s in orig_shape[:-1]:
        rows *= int(s)
    x2 = x.reshape(rows, D)

    itemsize = jnp.dtype(x.dtype).itemsize
    vmem_bytes, multi_core = _tpu_vmem_and_cores()

    if tile_rows is None:
        tile_rows, per_row_bytes = _pick_tile_rows(rows, D, itemsize, vmem_bytes, multi_core)
    else:
        per_row_bytes = D * (4 * itemsize + 12)
        tile_rows = max(8, min(int(tile_rows), _round_up(rows, 8)))

    grid_steps = pl.cdiv(rows, tile_rows)
    grid = (grid_steps,)

    # Explicit VMEM limit: ~2x the estimated tile working set (plus param blocks),
    # raised to >=32 MiB (v5e scoped default is 16 MiB) but capped at 3/4 of
    # physical VMEM so Mosaic scratch / param buffers always fit (48 MiB on v7x,
    # 96 MiB on v5e/v6e).
    working_set = per_row_bytes * tile_rows + 4 * D * 4 + (1 << 20)
    vmem_cap = (vmem_bytes * 3) // 4
    vmem_limit = int(max(16 << 20, min(vmem_cap, max(32 << 20, 2 * working_set))))

    # Hoisted params: cast once to f32; constant index_map keeps the (1, D)
    # blocks VMEM-resident across every grid step. None => identity affine.
    w2 = (jnp.ones((D,), jnp.float32) if weight is None
          else weight.astype(jnp.float32)).reshape(1, D)
    b2 = (jnp.zeros((D,), jnp.float32) if bias is None
          else bias.astype(jnp.float32)).reshape(1, D)

    # Small-block regime: short per-block DMAs expose issue latency under plain
    # double-buffering; use 3 input buffers (only worthwhile with >=3 grid steps).
    block_in_bytes = tile_rows * D * itemsize
    want_buffered3 = (D <= 256) and (block_in_bytes <= (1 << 20)) and (grid_steps >= 3)

    kernel = functools.partial(_layernorm_kernel, eps=float(eps), inv_d=1.0 / float(D))

    def _build(dim_semantics, buffered3):
        return pl.pallas_call(
            kernel,
            out_shape=jax.ShapeDtypeStruct((rows, D), x.dtype),
            grid_spec=pltpu.PrefetchScalarGridSpec(
                num_scalar_prefetch=0,
                grid=grid,
                in_specs=[
                    _make_x_spec(tile_rows, D, buffered3),
                    pl.BlockSpec((1, D), lambda i: (0, 0)),
                    pl.BlockSpec((1, D), lambda i: (0, 0)),
                ],
                out_specs=pl.BlockSpec((tile_rows, D), lambda i: (i, 0)),
            ),
            compiler_params=pltpu.CompilerParams(
                dimension_semantics=dim_semantics,
                vmem_limit_bytes=vmem_limit,
            ),
        )

    # Attempt order: CORE_PARALLEL on multi-TC chips (genuine 2-core split of the
    # DMA-bound row loop), then plain "parallel", then drop Buffered(3) -- each
    # fallback is the known-good conservative path.
    attempts = []
    if multi_core and grid_steps >= 2:
        core_sem = getattr(pltpu, "CORE_PARALLEL", None)
        if core_sem is not None:
            attempts.append(((core_sem,), want_buffered3))
    attempts.append((("parallel",), want_buffered3))
    if want_buffered3:
        attempts.append((("parallel",), False))

    out = None
    last_err = None
    for dim_semantics, buffered3 in attempts:
        try:
            out = _build(dim_semantics, buffered3)(x2, w2, b2)
            break
        except Exception as e:  # fall back to the more conservative configuration
            last_err = e
    if out is None:
        raise last_err

    return out.reshape(orig_shape)


if __name__ == "__main__":
    key = jax.random.PRNGKey(0)
    k1, k2, k3, k4 = jax.random.split(key, 4)

    def ref_ln(x, w, b, eps=1e-5):
        xf = x.astype(jnp.float32)
        mean = jnp.mean(xf, axis=-1, keepdims=True)
        var = jnp.mean((xf - mean) ** 2, axis=-1, keepdims=True)
        y = (xf - mean) * jax.lax.rsqrt(var + eps) * w + b
        return y.astype(x.dtype)

    # Case 1: GPT-style small shape (batch=2, seq=8, hidden=32), params as in
    # reset_parameters(): weight=1, bias=0.
    B, T, D = 2, 8, 32
    x = jax.random.normal(k1, (B, T, D), dtype=jnp.float32)
    weight = jnp.ones((D,), dtype=jnp.float32)
    bias = jnp.zeros((D,), dtype=jnp.float32)
    y = layer_norm(x, weight, bias, eps=1e-5)
    jax.block_until_ready(y)
    assert jnp.allclose(y, ref_ln(x, weight, bias), atol=1e-5, rtol=1e-5), "case1 mismatch"

    # Case 2: lane-dense D=128 with a row count (18) that does not divide the
    # tile, exercising the pad-free ragged-tail (masked store) path and a
    # non-trivial affine.
    B2, T2, D2 = 3, 6, 128
    x2 = jax.random.normal(k2, (B2, T2, D2), dtype=jnp.float32)
    w2 = 1.0 + 0.1 * jax.random.normal(k3, (D2,), dtype=jnp.float32)
    b2 = 0.1 * jax.random.normal(k4, (D2,), dtype=jnp.float32)
    y2 = layer_norm(x2, w2, b2, eps=1e-5)
    jax.block_until_ready(y2)
    assert jnp.allclose(y2, ref_ln(x2, w2, b2), atol=1e-5, rtol=1e-5), "case2 mismatch"

    print("KERNEL_OK")
</pallas_src>

<mosaic_0001>
module attributes {stable_mosaic.version = 11 : i64} {
  func.func @_layernorm_kernel(%arg0: i32, %arg1: memref<16x32xf32, #tpu.memory_space<vmem>>, %arg2: memref<1x32xf32, #tpu.memory_space<vmem>>, %arg3: memref<1x32xf32, #tpu.memory_space<vmem>>, %arg4: memref<16x32xf32, #tpu.memory_space<vmem>>) attributes {dimension_semantics = [#tpu.dimension_semantics<parallel>], iteration_bounds = array<i64: 1>, scalar_prefetch = 0 : i64, scratch_operands = 0 : i64, tpu.core_type = #tpu.core_type<tc>, window_params = [{transform_indices = @transform_0, window_bounds = array<i64: 16, 32>}, {pipeline_mode = #tpu.pipeline_mode<synchronous>, transform_indices = @transform_1, window_bounds = array<i64: 1, 32>}, {pipeline_mode = #tpu.pipeline_mode<synchronous>, transform_indices = @transform_2, window_bounds = array<i64: 1, 32>}, {transform_indices = @transform_3, window_bounds = array<i64: 16, 32>}]} {
    %c0 = arith.constant 0 : index
    %c0_0 = arith.constant 0 : index
    %0 = vector.load %arg1[%c0, %c0_0] : memref<16x32xf32, #tpu.memory_space<vmem>>, vector<16x32xf32>
    %cst = arith.constant dense<0.000000e+00> : vector<16xf32>
    %1 = vector.multi_reduction <add>, %0, %cst [1] : vector<16x32xf32> to vector<16xf32>
    %2 = vector.shape_cast %1 : vector<16xf32> to vector<16x1xf32>
    %3 = arith.mulf %0, %0 : vector<16x32xf32>
    %cst_1 = arith.constant dense<0.000000e+00> : vector<16xf32>
    %4 = vector.multi_reduction <add>, %3, %cst_1 [1] : vector<16x32xf32> to vector<16xf32>
    %5 = vector.shape_cast %4 : vector<16xf32> to vector<16x1xf32>
    %cst_2 = arith.constant 3.125000e-02 : f32
    %6 = vector.broadcast %cst_2 : f32 to vector<16x1xf32>
    %7 = arith.mulf %2, %6 : vector<16x1xf32>
    %cst_3 = arith.constant 3.125000e-02 : f32
    %8 = vector.broadcast %cst_3 : f32 to vector<16x1xf32>
    %9 = arith.mulf %5, %8 : vector<16x1xf32>
    %10 = arith.mulf %7, %7 : vector<16x1xf32>
    %11 = arith.subf %9, %10 : vector<16x1xf32>
    %cst_4 = arith.constant 0.000000e+00 : f32
    %12 = vector.broadcast %cst_4 : f32 to vector<16x1xf32>
    %13 = arith.maximumf %11, %12 : vector<16x1xf32>
    %cst_5 = arith.constant 9.99999974E-6 : f32
    %14 = vector.broadcast %cst_5 : f32 to vector<16x1xf32>
    %15 = arith.addf %13, %14 : vector<16x1xf32>
    %16 = math.rsqrt %15 : vector<16x1xf32>
    %c0_6 = arith.constant 0 : index
    %c0_7 = arith.constant 0 : index
    %17 = vector.load %arg2[%c0_6, %c0_7] : memref<1x32xf32, #tpu.memory_space<vmem>>, vector<1x32xf32>
    %18 = vector.broadcast %16 : vector<16x1xf32> to vector<16x32xf32>
    %19 = vector.broadcast %17 : vector<1x32xf32> to vector<16x32xf32>
    %20 = arith.mulf %18, %19 : vector<16x32xf32>
    %c0_8 = arith.constant 0 : index
    %c0_9 = arith.constant 0 : index
    %21 = vector.load %arg3[%c0_8, %c0_9] : memref<1x32xf32, #tpu.memory_space<vmem>>, vector<1x32xf32>
    %22 = vector.broadcast %7 : vector<16x1xf32> to vector<16x32xf32>
    %23 = arith.mulf %22, %20 : vector<16x32xf32>
    %24 = vector.broadcast %21 : vector<1x32xf32> to vector<16x32xf32>
    %25 = arith.subf %24, %23 : vector<16x32xf32>
    %26 = arith.mulf %0, %20 : vector<16x32xf32>
    %27 = arith.addf %26, %25 : vector<16x32xf32>
    %c0_10 = arith.constant 0 : index
    %c0_11 = arith.constant 0 : index
    %28 = vector.load %arg4[%c0_10, %c0_11] : memref<16x32xf32, #tpu.memory_space<vmem>>, vector<16x32xf32>
    tpu.vector_store %arg4[%c0_10, %c0_11], %27 {strides = array<i32>} : memref<16x32xf32, #tpu.memory_space<vmem>>, vector<16x32xf32>,
    return
  }
  func.func @transform_0(%arg0: i32) -> (i32, i32) {
    %c0_i32 = arith.constant 0 : i32
    %c0_i32_0 = arith.constant 0 : i32
    return %arg0, %c0_i32 : i32, i32
  }
  func.func @transform_1(%arg0: i32) -> (i32, i32) {
    %c0_i32 = arith.constant 0 : i32
    %c0_i32_0 = arith.constant 0 : i32
    %c0_i32_1 = arith.constant 0 : i32
    return %c0_i32, %c0_i32_0 : i32, i32
  }
  func.func @transform_2(%arg0: i32) -> (i32, i32) {
    %c0_i32 = arith.constant 0 : i32
    %c0_i32_0 = arith.constant 0 : i32
    %c0_i32_1 = arith.constant 0 : i32
    return %c0_i32, %c0_i32_0 : i32, i32
  }
  func.func @transform_3(%arg0: i32) -> (i32, i32) {
    %c0_i32 = arith.constant 0 : i32
    %c0_i32_0 = arith.constant 0 : i32
    return %arg0, %c0_i32 : i32, i32
  }
}

</mosaic_0001>

<bundles_post_ra>
// kernel: tpu_custom_call.1
= control target key start
LH: loop header
LB: loop body
LE: loop exit
PB: predicated region body
PF: predicated region fallthrough
CT: control target
= control target key end

     0   :  { %8 = vsyncpa [#allocation3], 0  ;;  %s227_s0 = inlined_call_operand.hbm [shape: f32[16,32], index: 0, kind: input, shape index: {}]   ;;  %s228_s1 = inlined_call_operand.vmem [shape: f32[1,32], index: 1, kind: input, shape index: {}]   ;;  %s229_s2 = inlined_call_operand.vmem [shape: f32[1,32], index: 2, kind: input, shape index: {}]   ;;  %s230_s3 = inlined_call_operand.hbm [shape: f32[16,32], index: 3, kind: output, shape index: {}]  }
   0x1   :  { %9 = vsyncpa [#allocation4], 0  ;;  %s161_s12 = smov [#allocation2]   ;;  %s113_s16 = scalar_lea.hbm %s227_s0, 256 }
   0x2   :  { %s15_s13 = sshll.u32 %s161_s12, 4  ;;  %p114_p0 = scmp.ne.s32.totalorder %s227_s0, %s113_s16  ;;  %s16_s13 = int_to_ptr.vmem [resolvable:$true] %s15_s13 }
   0x3   :  { %p117_p1 = scmp.lt.u32.totalorder %s113_s16, %s227_s0 }
   0x5   :  { %p119_p2 = pnand %p117_p1, %p114_p0 }
   0x7   :  { %122 = shalt.err (!%p119_p2)
}
   0x8   :  { %s123_s21 = scalar_lea.vmem %s16_s13, 256  ;;  %p128_p4 = scmp.lt.s32.totalorder %s16_s13, %s16_s13 }
   0x9   :  { %p124_p3 = scmp.ne.s32.totalorder %s16_s13, %s123_s21  ;;  %p129_p5 = scmp.lt.s32.totalorder %s123_s21, %s123_s21 }
   0xb   :  { %p130_p6 = por %p129_p5, %p128_p4 }
   0xd   :  { %p131_p7 = pnand %p130_p6, %p124_p3 }
   0xf   :  { %134 = shalt.err (!%p131_p7)
}
  0x10   :  { %s162_s22 = smov 128   ;;  %s163_s23 = smov 8  }
  0x11   :  { %21 = dma.hbm_to_vmem [thread:$0]  %s227_s0, 256, %s16_s13, [#allocation3], %s162_s22, %s162_s22, %s163_s23  }
  0x12   :  { %157 = dma.done.wait [#allocation3], 256  }
  0x13   :  { %158 = vsyncadd [#allocation3], 4294967040  ;;  %vm31_vm0 = vcmask 261120   ;;  %v29_v0 = vld [vmem:[#allocation2] sm:$0xff]  ;;  %v30_v1 = vld [vmem:[#allocation2 + $0x8] sm:$0xff]  ;;  %s164_s29 = smov [#allocation5]  }
  0x14   :  { %v32_v2 = vsel %vm31_vm0, %v29_v0, 0.0  ;;  %v38_v3 = vmul.f32 %v29_v0, %v29_v0  ;;  %v39_v4 = vmul.f32 %v30_v1, %v30_v1  ;;  %v35_v6 = vsel %vm31_vm0, %v30_v1, 0.0  ;;  %v103_v24 = vld [vmem:[%s228_s1] ss:$0 sm:$0xff]  ;;  %s91_s30 = sshll.u32 %s164_s29, 4  ;;  %s92_s30 = int_to_ptr.vmem [resolvable:$true] %s91_s30 }
  0x15   :  { %33 = vadd.xlane.f32.xlu0 %v32_v2  ;;  %v104_v27 = vld [vmem:[%s229_s2] ss:$0 sm:$0xff]  ;;  %s135_s1 = scalar_lea.vmem %s92_s30, 256  ;;  %p140_p9 = scmp.lt.s32.totalorder %s92_s30, %s92_s30 }
  0x16   :  { %v40_v5 = vsel %vm31_vm0, %v38_v3, 0.0  ;;  %v43_v7 = vsel %vm31_vm0, %v39_v4, 0.0  ;;  %p136_p8 = scmp.ne.s32.totalorder %s92_s30, %s135_s1  ;;  %p141_p10 = scmp.lt.s32.totalorder %s135_s1, %s135_s1 }
  0x17   :  { %41 = vadd.xlane.f32.xlu1 %v40_v5 }
  0x18   :  { %p142_p11 = por %p141_p10, %p140_p9 }
  0x19   :  { %36 = vadd.xlane.f32.xlu0 %v35_v6 }
  0x1a   :  { %p143_p12 = pnand %p142_p11, %p136_p8 }
  0x1b   :  { %44 = vadd.xlane.f32.xlu1 %v43_v7 }
  0xa2   :  { %v34_v8 = vpop.xlane.xlu0 %33 }
  0xa3   :  { %v46_v9 = vmul.f32 0.03125, %v34_v8 }
  0xa4   :  { %v42_v10 = vpop.xlane.xlu1 %41 }
  0xa5   :  { %v50_v11 = vmul.f32 %v46_v9, %v46_v9  ;;  %v48_v12 = vmul.f32 0.03125, %v42_v10 }
  0xa6   :  { %v37_v13 = vpop.xlane.xlu0 %36 }
  0xa7   :  { %v52_v14 = vsub.f32 %v48_v12, %v50_v11  ;;  %v47_v15 = vmul.f32 0.03125, %v37_v13 }
  0xa8   :  { %v45_v16 = vpop.xlane.xlu1 %44 }
  0xa9   :  { %v54_v17 = vmax.f32 %v52_v14, 0.0  ;;  %v51_v18 = vmul.f32 %v47_v15, %v47_v15  ;;  %v49_v19 = vmul.f32 0.03125, %v45_v16 }
  0xab   :  { %v56_v20 = vadd.f32 1e-05, %v54_v17  ;;  %v53_v21 = vsub.f32 %v49_v19, %v51_v18 }
  0xad   :  { %109 = vrsqrt.f32 %v56_v20  ;;  %v55_v22 = vmax.f32 %v53_v21, 0.0 }
  0xaf   :  { %v57_v23 = vadd.f32 1e-05, %v55_v22 }
  0xb1   :  { %111 = vrsqrt.f32 %v57_v23 }
  0xb7   :  { %v110_v25 = vpop.eup %109 }
  0xb8   :  { %v67_v26 = vmul.f32 %v110_v25, %v103_v24 }
  0xba   :  { %v70_v28 = vmul.f32 %v67_v26, %v46_v9  ;;  %v80_v32 = vmul.f32 %v67_v26, %v29_v0 }
  0xbb   :  { %v112_v29 = vpop.eup %111 }
  0xbc   :  { %v68_v30 = vmul.f32 %v112_v29, %v103_v24  ;;  %v78_v31 = vsub.f32 %v104_v27, %v70_v28 }
  0xbe   :  { %v71_v33 = vmul.f32 %v68_v30, %v47_v15  ;;  %v82_v34 = vadd.f32 %v80_v32, %v78_v31  ;;  %v81_v36 = vmul.f32 %v68_v30, %v30_v1 }
  0xc0   :  { %v79_v35 = vsub.f32 %v104_v27, %v71_v33  ;;  %84 = vst.msk [vmem:[#allocation5] sm:$0xff] %vm31_vm0, %v82_v34 }
  0xc2   :  { %v83_v37 = vadd.f32 %v81_v36, %v79_v35 }
  0xc4   :  { %85 = vst.msk [vmem:[#allocation5 + $0x8] sm:$0xff] %vm31_vm0, %v83_v37 }
  0xc5   :  { %146 = shalt.err (!%p143_p12)
}
  0xc6   :  { %s147_s5 = scalar_lea.hbm %s230_s3, 256 }
  0xc7   :  { %p148_p13 = scmp.ne.s32.totalorder %s230_s3, %s147_s5  ;;  %p151_p0 = scmp.lt.u32.totalorder %s147_s5, %s230_s3 }
  0xc9   :  { %p153_p1 = pnand %p151_p0, %p148_p13 }
  0xcb   :  { %156 = shalt.err (!%p153_p1)
}
  0xcc   :  { %97 = dma.vmem_to_hbm [thread:$0]  %s92_s30, 256, %s230_s3, [#allocation4], %s162_s22, %s162_s22, %s163_s23  }
  0xcd   :  { %159 = dma.done.wait [#allocation4], 256  }
  0xce   :  { %160 = vsyncadd [#allocation4], 4294967040 }
  0xcf   :  { %101 = vsyncpa [#allocation3], 1 }
  0xd0   :  { %102 = vsyncpa [#allocation4], 1 }

</bundles_post_ra>
